<compile_context>
chip_gen: v7x
topology: tpu7x:2x2x1
jax: 0.10.0
libtpu: 0.0.40
codegen_flags: <defaults>
</compile_context>

<pallas_src>
import numpy as np
import jax
import jax.numpy as jnp
from jax.experimental import pallas as pl
from jax.experimental.pallas import tpu as pltpu

# --- deterministic "fft_conf" (small, test-friendly; torchaudio defaults otherwise) ---
N_FFT = 16
WIN_LENGTH = N_FFT              # torchaudio default: win_length = n_fft
HOP = WIN_LENGTH // 2           # torchaudio default: hop_length = win_length // 2
N_FREQ = N_FFT // 2 + 1         # onesided=True -> 9
# power=2.0, normalized=False, center=True, pad_mode='reflect' (torchaudio defaults)

FRAMES_PER_ROW = 15             # 14*hop + n_fft == 128 -> one lane-dense row
ROW_SAMPLES = 128               # samples per packed row (K of the MXU matmul)
ROW_STRIDE = FRAMES_PER_ROW * HOP            # 120 (rows overlap by n_fft - hop = 8)
OVERLAP = ROW_SAMPLES - ROW_STRIDE           # 8 samples borrowed from the next row
OUT_W = FRAMES_PER_ROW * N_FREQ              # 135 output values per row, all valid


def _round_up(x, m):
    return ((x + m - 1) // m) * m


def _build_block_basis():
    """Block-diagonal windowed real-DFT basis.

    br/bi: (128, 135).  Column 9*j + k holds the hann*cos / hann*(-sin) coefficient for
    frame j (samples [8j, 8j+16) of the 128-sample row) at frequency bin k.
    """
    n = np.arange(N_FFT)
    k = np.arange(N_FREQ)
    ang = 2.0 * np.pi * np.outer(n, k) / N_FFT
    # periodic Hann window (torch.hann_window default periodic=True)
    win = 0.5 * (1.0 - np.cos(2.0 * np.pi * np.arange(WIN_LENGTH) / WIN_LENGTH))
    br_small = (win[:, None] * np.cos(ang)).astype(np.float32)      # (16, 9)
    bi_small = (win[:, None] * (-np.sin(ang))).astype(np.float32)   # (16, 9)
    br = np.zeros((ROW_SAMPLES, OUT_W), np.float32)
    bi = np.zeros((ROW_SAMPLES, OUT_W), np.float32)
    for j in range(FRAMES_PER_ROW):
        br[HOP * j:HOP * j + N_FFT, N_FREQ * j:N_FREQ * (j + 1)] = br_small
        bi[HOP * j:HOP * j + N_FFT, N_FREQ * j:N_FREQ * (j + 1)] = bi_small
    return jnp.asarray(br), jnp.asarray(bi)


def _spectrogram_kernel(rows_ref, br_ref, bi_ref, out_ref):
    """rows (tile, 128) @ block-diag DFT basis -> power spectrum (tile, 135)."""
    rows = rows_ref[...]
    zr = jnp.dot(rows, br_ref[...], preferred_element_type=jnp.float32)
    zi = jnp.dot(rows, bi_ref[...], preferred_element_type=jnp.float32)
    out_ref[...] = zr * zr + zi * zi


def _power_spectrogram(data, *, row_tile=1024):
    """data: (B, C, T) float32 -> (B, C, num_frames, N_FREQ) power spectrogram."""
    B, C, T = data.shape
    pad = N_FFT // 2
    xp = jnp.pad(data, ((0, 0), (0, 0), (pad, pad)), mode="reflect")   # center=True
    t_pad = xp.shape[-1]
    n_frames = 1 + (t_pad - N_FFT) // HOP

    bc = B * C
    n_rows = pl.cdiv(n_frames, FRAMES_PER_ROW)
    # Choose the row tile so that total padding waste is < one tile (instead of
    # blindly rounding n_rows up to a power-of-two-ish tile), sublane aligned.
    n_blocks = pl.cdiv(n_rows, row_tile)
    tr = _round_up(pl.cdiv(n_rows, n_blocks), 8)
    n_rows_pad = tr * n_blocks

    # Zero-pad time so every (possibly padding) packed row can read 128 samples and both
    # reshapes below are exact.  Padding rows produce zeros and are sliced off afterwards.
    l_need = ROW_STRIDE * (n_rows_pad + 1)
    xp_flat = jnp.pad(xp.reshape(bc, t_pad), ((0, 0), (0, l_need - t_pad)))

    # Overlapping 128-sample rows (stride 120) WITHOUT an XLA gather:
    #   rows[:, :, :120]   = contiguous reshape of the signal
    #   rows[:, :, 120:128] = first 8 samples of the next 120-sample chunk
    main = xp_flat[:, :ROW_STRIDE * n_rows_pad].reshape(bc, n_rows_pad, ROW_STRIDE)
    nxt = xp_flat[:, ROW_STRIDE:ROW_STRIDE * (n_rows_pad + 1)].reshape(
        bc, n_rows_pad, ROW_STRIDE)
    rows = jnp.concatenate([main, nxt[:, :, :OVERLAP]], axis=-1)   # (bc, n_rows_pad, 128)

    br, bi = _build_block_basis()

    flops = 2 * 2 * bc * n_rows_pad * ROW_SAMPLES * OUT_W    # two (tile,128)x(128,135) matmuls
    bytes_accessed = 4 * (rows.size + br.size + bi.size + bc * n_rows_pad * OUT_W)

    out = pl.pallas_call(
        _spectrogram_kernel,
        out_shape=jax.ShapeDtypeStruct((bc, n_rows_pad, OUT_W), jnp.float32),
        grid=(bc, n_blocks),
        in_specs=[
            pl.BlockSpec((None, tr, ROW_SAMPLES), lambda b, r: (b, r, 0)),
            # constant bases: block index never changes -> fetched once, stay resident
            pl.BlockSpec((ROW_SAMPLES, OUT_W), lambda b, r: (0, 0)),
            pl.BlockSpec((ROW_SAMPLES, OUT_W), lambda b, r: (0, 0)),
        ],
        out_specs=pl.BlockSpec((None, tr, OUT_W), lambda b, r: (b, r, 0)),
        compiler_params=pltpu.CompilerParams(
            dimension_semantics=("parallel", "parallel")),
        cost_estimate=pl.CostEstimate(
            flops=flops, transcendentals=0, bytes_accessed=bytes_accessed),
    )(rows, br, bi)

    # (bc, rows, 15*9) -> (bc, rows*15, 9) is a pure metadata reshape (frame-major layout)
    pwr = out.reshape(bc, n_rows_pad * FRAMES_PER_ROW, N_FREQ)
    pwr = pwr[:, :n_frames, :].reshape(B, C, n_frames, N_FREQ)
    return pwr


def spectrogram_forward(batch):
    """Mirrors Spectrogram.forward: batch['feature'] = {'data': pwr_spec, 'len': new_len}."""
    data = batch["feature"]["data"]          # (B, C, T)
    feat_len = batch["feature"]["len"]       # (B,)

    feature_pwr = _power_spectrogram(data)   # (B, C, num_frames, n_freq) == transpose(-1,-2)

    # ((feature_len - n_fft) / hop_length + 3).floor().to(int32)
    new_len = jnp.floor((feat_len.astype(jnp.float32) - N_FFT) / HOP + 3).astype(jnp.int32)

    return {"feature": {"data": feature_pwr, "len": new_len}}


if __name__ == "__main__":
    key = jax.random.PRNGKey(0)
    B, C, T = 2, 4, 64
    data = jax.random.normal(key, (B, C, T), dtype=jnp.float32)
    feat_len = jnp.full((B,), float(T), dtype=jnp.float32)

    batch = {"feature": {"data": data, "len": feat_len}}
    out = spectrogram_forward(batch)
    jax.block_until_ready(out["feature"]["data"])
    jax.block_until_ready(out["feature"]["len"])

    # reference: rfft power of centered (reflect padded) hann-windowed frames
    pad = N_FFT // 2
    xp = jnp.pad(data, ((0, 0), (0, 0), (pad, pad)), mode="reflect")
    n_frames = 1 + (xp.shape[-1] - N_FFT) // HOP
    fidx = jnp.arange(n_frames)[:, None] * HOP + jnp.arange(N_FFT)[None, :]
    frames = xp[..., fidx]                                   # (B, C, n_frames, 16)
    win = 0.5 * (1.0 - jnp.cos(2.0 * jnp.pi * jnp.arange(WIN_LENGTH) / WIN_LENGTH))
    ref = jnp.abs(jnp.fft.rfft(frames * win, n=N_FFT, axis=-1)) ** 2

    got = out["feature"]["data"]
    assert got.shape == ref.shape, (got.shape, ref.shape)
    np.testing.assert_allclose(np.asarray(got), np.asarray(ref), rtol=1e-4, atol=1e-3)
    expected_len = np.floor((np.asarray(feat_len) - N_FFT) / HOP + 3).astype(np.int32)
    np.testing.assert_array_equal(np.asarray(out["feature"]["len"]), expected_len)

    print("KERNEL_OK")
</pallas_src>

<mosaic_0001>
module attributes {stable_mosaic.version = 11 : i64} {
  func.func @_spectrogram_kernel(%arg0: i32, %arg1: i32, %arg2: memref<1x8x128xf32, #tpu.memory_space<vmem>>, %arg3: memref<128x135xf32, #tpu.memory_space<vmem>>, %arg4: memref<128x135xf32, #tpu.memory_space<vmem>>, %arg5: memref<1x8x135xf32, #tpu.memory_space<vmem>>) attributes {dimension_semantics = [#tpu.dimension_semantics<parallel>, #tpu.dimension_semantics<parallel>], iteration_bounds = array<i64: 8, 1>, scalar_prefetch = 0 : i64, scratch_operands = 0 : i64, tpu.core_type = #tpu.core_type<tc>, window_params = [{transform_indices = @transform_0, window_bounds = array<i64: 1, 8, 128>}, {pipeline_mode = #tpu.pipeline_mode<synchronous>, transform_indices = @transform_1, window_bounds = array<i64: 128, 135>}, {pipeline_mode = #tpu.pipeline_mode<synchronous>, transform_indices = @transform_2, window_bounds = array<i64: 128, 135>}, {transform_indices = @transform_3, window_bounds = array<i64: 1, 8, 135>}]} {
    %c0 = arith.constant 0 : index
    %c0_0 = arith.constant 0 : index
    %c0_1 = arith.constant 0 : index
    %0 = vector.load %arg2[%c0, %c0_0, %c0_1] : memref<1x8x128xf32, #tpu.memory_space<vmem>>, vector<1x8x128xf32>
    %1 = vector.shape_cast %0 : vector<1x8x128xf32> to vector<8x128xf32>
    %c0_2 = arith.constant 0 : index
    %c0_3 = arith.constant 0 : index
    %2 = vector.load %arg3[%c0_2, %c0_3] : memref<128x135xf32, #tpu.memory_space<vmem>>, vector<128x135xf32>
    %cst = arith.constant dense<0.000000e+00> : vector<8x135xf32>
    %3 = tpu.matmul %1, %2, %cst {dimension_numbers = #tpu.dot_dimension_numbers<[1], [0], [0], [1], [0, 0, 1, 1], [], []>} : vector<8x128xf32>, vector<128x135xf32>, vector<8x135xf32> -> vector<8x135xf32>
    %c0_4 = arith.constant 0 : index
    %c0_5 = arith.constant 0 : index
    %4 = vector.load %arg4[%c0_4, %c0_5] : memref<128x135xf32, #tpu.memory_space<vmem>>, vector<128x135xf32>
    %cst_6 = arith.constant dense<0.000000e+00> : vector<8x135xf32>
    %5 = tpu.matmul %1, %4, %cst_6 {dimension_numbers = #tpu.dot_dimension_numbers<[1], [0], [0], [1], [0, 0, 1, 1], [], []>} : vector<8x128xf32>, vector<128x135xf32>, vector<8x135xf32> -> vector<8x135xf32>
    %6 = arith.mulf %3, %3 : vector<8x135xf32>
    %7 = arith.mulf %5, %5 : vector<8x135xf32>
    %8 = arith.addf %6, %7 : vector<8x135xf32>
    %c0_7 = arith.constant 0 : index
    %c0_8 = arith.constant 0 : index
    %c0_9 = arith.constant 0 : index
    %9 = vector.load %arg5[%c0_7, %c0_8, %c0_9] : memref<1x8x135xf32, #tpu.memory_space<vmem>>, vector<1x8x135xf32>
    %10 = vector.shape_cast %9 : vector<1x8x135xf32> to vector<8x135xf32>
    %11 = vector.shape_cast %8 : vector<8x135xf32> to vector<1x8x135xf32>
    tpu.vector_store %arg5[%c0_7, %c0_8, %c0_9], %11 {strides = array<i32>} : memref<1x8x135xf32, #tpu.memory_space<vmem>>, vector<1x8x135xf32>,
    return
  }
  func.func @transform_0(%arg0: i32, %arg1: i32) -> (i32, i32, i32) {
    %c0_i32 = arith.constant 0 : i32
    %c0_i32_0 = arith.constant 0 : i32
    return %arg0, %arg1, %c0_i32 : i32, i32, i32
  }
  func.func @transform_1(%arg0: i32, %arg1: i32) -> (i32, i32) {
    %c0_i32 = arith.constant 0 : i32
    %c0_i32_0 = arith.constant 0 : i32
    %c0_i32_1 = arith.constant 0 : i32
    return %c0_i32, %c0_i32_0 : i32, i32
  }
  func.func @transform_2(%arg0: i32, %arg1: i32) -> (i32, i32) {
    %c0_i32 = arith.constant 0 : i32
    %c0_i32_0 = arith.constant 0 : i32
    %c0_i32_1 = arith.constant 0 : i32
    return %c0_i32, %c0_i32_0 : i32, i32
  }
  func.func @transform_3(%arg0: i32, %arg1: i32) -> (i32, i32, i32) {
    %c0_i32 = arith.constant 0 : i32
    %c0_i32_0 = arith.constant 0 : i32
    return %arg0, %arg1, %c0_i32 : i32, i32, i32
  }
}

</mosaic_0001>

<bundles_post_ra>
// kernel: tpu_custom_call.1
= control target key start
LH: loop header
LB: loop body
LE: loop exit
PB: predicated region body
PF: predicated region fallthrough
CT: control target
= control target key end

     0   :  { %8 = vsyncpa [#allocation3], 0  ;;  %s1038_s0 = inlined_call_operand.vmem [shape: f32[8,8,128], index: 0, kind: input, shape index: {}]   ;;  %s1039_s1 = inlined_call_operand.vmem [shape: f32[128,135], index: 1, kind: input, shape index: {}]   ;;  %s1040_s2 = inlined_call_operand.vmem [shape: f32[128,135], index: 2, kind: input, shape index: {}]   ;;  %s1041_s3 = inlined_call_operand.hbm [shape: f32[8,8,135], index: 3, kind: output, shape index: {}]  }
   0x1   :  { %10 = vsyncpa [#allocation3 + $0x1], 0  ;;  %s732_s12 = smov 0   ;;  %s734_s13 = smov 0  }
   0x2   :  { %s736_s14 = smov 0   ;;  %s738_s15 = smov 0  }
   0x3   :  { %s740_s16 = smov 0   ;;  %s742_s17 = smov 0  }
   0x4 LB: > { %s497_s18 = sadd.s32 4294967295, %s708_s17   ;;  %s498_s19 = sadd.s32 4294967294, %s708_s17   ;;  %s708_s17 = sphi %s742_s17, %s16_s17   ;;  %s704_s16 = sphi %s740_s16, %s1048_s16   ;;  %s700_s15 = sphi %s738_s15, %s1047_s15   ;;  %s696_s14 = sphi %s736_s14, %s1046_s14   ;;  %s692_s13 = sphi %s734_s13, %s1045_s13   ;;  %s688_s12 = sphi %s732_s12, %s1044_s12  }
   0x5   : > { %s28_s20 = sadd.s32 1, %s704_s16  ;;  %s107_s21 = sadd.s32 1, %s696_s14 }
   0x6   : > { %p30_p0 = scmp.ge.s32.totalorder %s28_s20, 8  ;;  %p117_p1 = scmp.ne.s32.totalorder %s696_s14, %s692_s13 }
   0x7   : > { %p118_p2 = scmp.eq.s32.totalorder %s497_s18, 7  ;;  %p123_p3 = scmp.ne.s32.totalorder %s692_s13, %s688_s12 }
   0x8   : > { %s1050_s20 = smov (%p30_p0, %s28_s20), 0  ;;  %p124_p5 = scmp.eq.s32.totalorder %s498_s19, 7 }
   0x9   : > { %p772_p4 = por %p118_p2, %p117_p1  ;;  %s102_s23 = ssub.s32 %s704_s16, %s1050_s20 }
   0xa   : > { %p501_p6 = scmp.ge.s32.totalorder %s708_s17, 1  ;;  %p105_p7 = scmp.eq.s32.totalorder %s102_s23, 0 }
   0xb   : > { %p779_p8 = por %p124_p5, %p123_p3  ;;  %p158_p9 = scmp.lt.s32.totalorder %s708_s17, 9 }
   0xc   : > { %s785_s25 = scalar_select %p105_p7, %s696_s14, %s107_s21  }
   0xd   : > { %p159_p10 = pnand %p501_p6, %p158_p9 }
   0xe   : > { %v193_v0 = vld [vmem:[%s1039_s1 + $0x8] sm:$0xff] (!%p159_p10)  ;;  %v195_v1 = vld [vmem:[%s1039_s1 + $0x18] sm:$0xff] (!%p159_p10)  ;;  %v192_v5 = vld [vmem:[%s1039_s1] sm:$0xff] (!%p159_p10)  ;;  %v710_v7 = vmov (!%p159_p10), 0.0   ;;  %p184_p11 = scmp.lt.s32.totalorder (!%p159_p10), %s700_s15, 7  ;;  %s181_s21 = sand.u32 (!%p159_p10), 1, %s692_s13  }
   0xf   : > { %162 = sbr.rel (%p159_p10) target bundleno = 281 (0x119), region = 32  ;;  %v296_v2 = vld [vmem:[%s1040_s2 + $0x8] sm:$0xff] (!%p159_p10)  ;;  %v510_v3 = vpack.c.bf16 (!%p159_p10), %v195_v1, %v193_v0  ;;  %v298_v4 = vld [vmem:[%s1040_s2 + $0x18] sm:$0xff] (!%p159_p10)  ;;  %v194_v6 = vld [vmem:[%s1039_s1 + $0x10] sm:$0xff] (!%p159_p10)  ;;  %288 = vmatprep.mubr.f32.mxu0 (!%p159_p10), %v710_v7  ;;  %391 = vmatprep.mubr.f32.mxu1 (!%p159_p10), %v710_v7  ;;  %s502_s23 = sshll.u32 (!%p159_p10), %s181_s21, 4  ;;  %vm405_vm0 = vcmask (!%p159_p10), 56320  }
  0x10   : > { %v542_v8 = vpack.c.bf16 (!%p159_p10), %v298_v4, %v296_v2  ;;  %v512_v9 = vpack.c.bf16 (!%p159_p10), %v194_v6, %v192_v5  ;;  %v295_v10 = vld [vmem:[%s1040_s2] sm:$0xff] (!%p159_p10)  ;;  %v297_v11 = vld [vmem:[%s1040_s2 + $0x10] sm:$0xff] (!%p159_p10)  ;;  %v197_v12 = vld [vmem:[%s1039_s1 + $0x28] sm:$0xff] (!%p159_p10)  ;;  %s183_s26 = scalar_lea.vmem (!%p159_p10), [#allocation2], %s502_s23  ;;  %s408_s4 = scalar_lea.sflag (!%p159_p10), [#allocation3], %s181_s21 }
  0x11   : > { %511 = vmatprep.subr.bf16.mxu0 (!%p159_p10), %v510_v3  ;;  %v544_v13 = vpack.c.bf16 (!%p159_p10), %v297_v11, %v295_v10  ;;  %v199_v14 = vld [vmem:[%s1039_s1 + $0x38] sm:$0xff] (!%p159_p10)  ;;  %v300_v15 = vld [vmem:[%s1040_s2 + $0x28] sm:$0xff] (!%p159_p10)  ;;  %v196_v19 = vld [vmem:[%s1039_s1 + $0x20] sm:$0xff] (!%p159_p10)  ;;  %s424_s27 = sshll.u32 (!%p159_p10), %s183_s26, 4  ;;  %s711_s5 = smov (!%p159_p10), [#allocation2]   ;;  %s993_s27 = int_to_ptr.vmem [resolvable:$true] %s424_s27 }
  0x12   : > { %v302_v16 = vld [vmem:[%s1040_s2 + $0x38] sm:$0xff] (!%p159_p10)  ;;  %543 = vmatprep.subr.bf16.mxu1 (!%p159_p10), %v542_v8  ;;  %513 = vmatpush1.bf16.msra.mxu0 (!%p159_p10), %v512_v9  ;;  %v514_v17 = vpack.c.bf16 (!%p159_p10), %v199_v14, %v197_v12  ;;  %v198_v20 = vld [vmem:[%s1039_s1 + $0x30] sm:$0xff] (!%p159_p10)  ;;  %v299_v21 = vld [vmem:[%s1040_s2 + $0x20] sm:$0xff] (!%p159_p10)  ;;  %s634_s6 = sshll.u32 (!%p159_p10), %s711_s5, 4  ;;  %s635_s6 = int_to_ptr.vmem [resolvable:$false] %s634_s6 }
  0x13   : > { %v546_v18 = vpack.c.bf16 (!%p159_p10), %v302_v16, %v300_v15  ;;  %545 = vmatpush1.bf16.msra.mxu1 (!%p159_p10), %v544_v13  ;;  %v516_v22 = vpack.c.bf16 (!%p159_p10), %v198_v20, %v196_v19  ;;  %v301_v23 = vld [vmem:[%s1040_s2 + $0x30] sm:$0xff] (!%p159_p10)  ;;  %v201_v24 = vld [vmem:[%s1039_s1 + $0x48] sm:$0xff] (!%p159_p10)  ;;  %v203_v25 = vld [vmem:[%s1039_s1 + $0x58] sm:$0xff] (!%p159_p10)  ;;  %s636_s7 = scalar_lea.vmem (!%p159_p10), %s635_s6, 512  ;;  %p637_p1 = scmp.lt.s32.totalorder (!%p159_p10), %s993_s27, %s635_s6 }
  0x14   : > { %515 = vmatprep.subr.bf16.mxu0 (!%p159_p10), %v514_v17  ;;  %v548_v26 = vpack.c.bf16 (!%p159_p10), %v301_v23, %v299_v21  ;;  %v518_v27 = vpack.c.bf16 (!%p159_p10), %v203_v25, %v201_v24  ;;  %v304_v28 = vld [vmem:[%s1040_s2 + $0x48] sm:$0xff] (!%p159_p10)  ;;  %v306_v29 = vld [vmem:[%s1040_s2 + $0x58] sm:$0xff] (!%p159_p10)  ;;  %v200_v30 = vld [vmem:[%s1039_s1 + $0x40] sm:$0xff] (!%p159_p10) }
  0x15   : > { %547 = vmatprep.subr.bf16.mxu1 (!%p159_p10), %v546_v18  ;;  %v550_v31 = vpack.c.bf16 (!%p159_p10), %v306_v29, %v304_v28  ;;  %v202_v32 = vld [vmem:[%s1039_s1 + $0x50] sm:$0xff] (!%p159_p10)  ;;  %v303_v33 = vld [vmem:[%s1040_s2 + $0x40] sm:$0xff] (!%p159_p10)  ;;  %v205_v36 = vld [vmem:[%s1039_s1 + $0x68] sm:$0xff] (!%p159_p10) }
  0x16   : > { %v305_v34 = vld [vmem:[%s1040_s2 + $0x50] sm:$0xff]  ;;  %517 = vmatpush1.bf16.msra.mxu0 %v516_v22  ;;  %v520_v35 = vpack.c.bf16 %v202_v32, %v200_v30  ;;  %v207_v37 = vld [vmem:[%s1039_s1 + $0x78] sm:$0xff]  ;;  %v308_v38 = vld [vmem:[%s1040_s2 + $0x68] sm:$0xff]  ;;  %s185_s19 = scalar_select %p184_p11, %s700_s15, 7 }
  0x17   : > { %549 = vmatpush1.bf16.msra.mxu1 %v548_v26  ;;  %519 = vmatprep.subr.bf16.mxu0 %v518_v27  ;;  %v552_v39 = vpack.c.bf16 %v305_v34, %v303_v33  ;;  %v522_v40 = vpack.c.bf16 %v207_v37, %v205_v36  ;;  %v310_v41 = vld [vmem:[%s1040_s2 + $0x78] sm:$0xff]  ;;  %v204_v42 = vld [vmem:[%s1039_s1 + $0x60] sm:$0xff]  ;;  %v206_v43 = vld [vmem:[%s1039_s1 + $0x70] sm:$0xff] }
  0x18   : > { %551 = vmatprep.subr.bf16.mxu1 %v550_v31  ;;  %v554_v44 = vpack.c.bf16 %v310_v41, %v308_v38  ;;  %v307_v45 = vld [vmem:[%s1040_s2 + $0x60] sm:$0xff]  ;;  %v309_v46 = vld [vmem:[%s1040_s2 + $0x70] sm:$0xff]  ;;  %v209_v47 = vld [vmem:[%s1039_s1 + $0x88] sm:$0xff]  ;;  %v524_v51 = vpack.c.bf16 %v206_v43, %v204_v42  ;;  %s503_s9 = sshll.u32 %s185_s19, 3  ;;  %s509_s19 = sshll.u32 %s700_s15, 8 }
  0x19   : > { %v211_v48 = vld [vmem:[%s1039_s1 + $0x98] sm:$0xff]  ;;  %v312_v49 = vld [vmem:[%s1040_s2 + $0x88] sm:$0xff]  ;;  %v556_v52 = vpack.c.bf16 %v309_v46, %v307_v45  ;;  %v208_v54 = vld [vmem:[%s1039_s1 + $0x80] sm:$0xff]  ;;  %s190_s18 = scalar_lea.vmem %s1038_s0, %s503_s9  ;;  %s991_s30 = scalar_lea.hbm %s1041_s3, %s509_s19 }
  0x1a   : > { %v314_v50 = vld [vmem:[%s1040_s2 + $0x98] sm:$0xff]  ;;  %521 = vmatpush1.bf16.msra.mxu0 %v520_v35  ;;  %v526_v53 = vpack.c.bf16 %v211_v48, %v209_v47  ;;  %v210_v55 = vld [vmem:[%s1039_s1 + $0x90] sm:$0xff]  ;;  %v311_v56 = vld [vmem:[%s1040_s2 + $0x80] sm:$0xff]  ;;  %s630_s15 = scalar_lea.vmem %s993_s27, 256 }
  0x1b   : > { %553 = vmatpush1.bf16.msra.mxu1 %v552_v39  ;;  %523 = vmatprep.subr.bf16.mxu0 %v522_v40  ;;  %v558_v57 = vpack.c.bf16 %v314_v50, %v312_v49  ;;  %v313_v58 = vld [vmem:[%s1040_s2 + $0x90] sm:$0xff]  ;;  %v213_v59 = vld [vmem:[%s1039_s1 + $0xa8] sm:$0xff]  ;;  %v215_v60 = vld [vmem:[%s1039_s1 + $0xb8] sm:$0xff]  ;;  %v528_v63 = vpack.c.bf16 %v210_v55, %v208_v54  ;;  %p631_p12 = scmp.ne.s32.totalorder %s993_s27, %s630_s15  ;;  %p638_p2 = scmp.lt.s32.totalorder %s636_s7, %s630_s15 }
  0x1c   : > { %555 = vmatprep.subr.bf16.mxu1 %v554_v44  ;;  %v316_v61 = vld [vmem:[%s1040_s2 + $0xa8] sm:$0xff]  ;;  %v318_v62 = vld [vmem:[%s1040_s2 + $0xb8] sm:$0xff]  ;;  %v560_v0 = vpack.c.bf16 %v313_v58, %v311_v56  ;;  %v530_v1 = vpack.c.bf16 %v215_v60, %v213_v59  ;;  %v212_v2 = vld [vmem:[%s1039_s1 + $0xa0] sm:$0xff] }
  0x1d   : > { %v214_v3 = vld [vmem:[%s1039_s1 + $0xb0] sm:$0xff]  ;;  %v315_v4 = vld [vmem:[%s1040_s2 + $0xa0] sm:$0xff]  ;;  %v562_v5 = vpack.c.bf16 %v318_v62, %v316_v61  ;;  %v217_v7 = vld [vmem:[%s1039_s1 + $0xc8] sm:$0xff]  ;;  %p632_p13 = pnand %p631_p12, %p772_p4  ;;  %p639_p3 = por %p638_p2, %p637_p1 }
  0x1e   : > { %525 = vmatpush1.bf16.msra.mxu0 %v524_v51  ;;  %v317_v6 = vld [vmem:[%s1040_s2 + $0xb0] sm:$0xff]  ;;  %v219_v8 = vld [vmem:[%s1039_s1 + $0xd8] sm:$0xff]  ;;  %v320_v9 = vld [vmem:[%s1040_s2 + $0xc8] sm:$0xff]  ;;  %v532_v11 = vpack.c.bf16 %v214_v3, %v212_v2 }
  0x1f   : > { %557 = vmatpush1.bf16.msra.mxu1 %v556_v52  ;;  %527 = vmatprep.subr.bf16.mxu0 %v526_v53  ;;  %v322_v10 = vld [vmem:[%s1040_s2 + $0xd8] sm:$0xff]  ;;  %v564_v12 = vpack.c.bf16 %v317_v6, %v315_v4  ;;  %v534_v13 = vpack.c.bf16 %v219_v8, %v217_v7  ;;  %v216_v14 = vld [vmem:[%s1039_s1 + $0xc0] sm:$0xff]  ;;  %v218_v15 = vld [vmem:[%s1039_s1 + $0xd0] sm:$0xff]  ;;  %p633_p0 = pneg %p632_p13 }
  0x20   : > { %559 = vmatprep.subr.bf16.mxu1 %v558_v57  ;;  %v319_v16 = vld [vmem:[%s1040_s2 + $0xc0] sm:$0xff]  ;;  %v566_v17 = vpack.c.bf16 %v322_v10, %v320_v9  ;;  %v321_v18 = vld [vmem:[%s1040_s2 + $0xd0] sm:$0xff]  ;;  %v221_v19 = vld [vmem:[%s1039_s1 + $0xe8] sm:$0xff]  ;;  %v536_v23 = vpack.c.bf16 %v218_v15, %v216_v14 }
  0x21   : > { %v223_v20 = vld [vmem:[%s1039_s1 + $0xf8] sm:$0xff]  ;;  %v324_v21 = vld [vmem:[%s1040_s2 + $0xe8] sm:$0xff]  ;;  %v568_v24 = vpack.c.bf16 %v321_v18, %v319_v16  ;;  %v220_v26 = vld [vmem:[%s1039_s1 + $0xe0] sm:$0xff]  ;;  %p640_p5 = pnand %p639_p3, %p633_p0 }
  0x22   : > { %529 = vmatpush1.bf16.msra.mxu0 %v528_v63  ;;  %v326_v22 = vld [vmem:[%s1040_s2 + $0xf8] sm:$0xff]  ;;  %v538_v25 = vpack.c.bf16 %v223_v20, %v221_v19  ;;  %v222_v27 = vld [vmem:[%s1039_s1 + $0xf0] sm:$0xff]  ;;  %v323_v29 = vld [vmem:[%s1040_s2 + $0xe0] sm:$0xff] }
  0x23   : > { %561 = vmatpush1.bf16.msra.mxu1 %v560_v0  ;;  %531 = vmatprep.subr.bf16.mxu0 %v530_v1  ;;  %v570_v28 = vpack.c.bf16 %v326_v22, %v324_v21  ;;  %v325_v30 = vld [vmem:[%s1040_s2 + $0xf0] sm:$0xff]  ;;  %v540_v31 = vpack.c.bf16 %v222_v27, %v220_v26  ;;  %v191_v33 = vld [vmem:[%s190_s18] sm:$0xff] }
  0x24   : > { %563 = vmatprep.subr.bf16.mxu1 %v562_v5  ;;  %v572_v32 = vpack.c.bf16 %v325_v30, %v323_v29 }
  0x26   : > { %533 = vmatpush1.bf16.msra.mxu0 %v532_v11 }
  0x27   : > { %565 = vmatpush1.bf16.msra.mxu1 %v564_v12  ;;  %535 = vmatprep.subr.bf16.mxu0 %v534_v13 }
  0x28   : > { %567 = vmatprep.subr.bf16.mxu1 %v566_v17 }
  0x2a   : > { %537 = vmatpush1.bf16.msra.mxu0 %v536_v23 }
  0x2b   : > { %569 = vmatpush1.bf16.msra.mxu1 %v568_v24  ;;  %539 = vmatprep.subr.bf16.mxu0 %v538_v25 }
  0x2c   : > { %571 = vmatprep.subr.bf16.mxu1 %v570_v28 }
  0x2e   : > { %541 = vmatpush1.bf16.msra.mxu0 %v540_v31 }
  0x2f   : > { %573 = vmatpush1.bf16.msra.mxu1 %v572_v32 }
  0x31   : > { %289 = vmatmul.mubr.f32.vlgmr.msra.gmra.mrb[0].mxu0 %v191_v33 }
  0x32   : > { %392 = vmatmul.mubr.f32.vlgmr.msra.gmra.mrb[0].mxu1 %v191_v33 }
 0x104   : > { %v290_v34 = vpop.f32.mrb[0].mxu0 }
 0x105   : > { %v398_v35 = vmul.f32 %v290_v34, %v290_v34  ;;  %v393_v36 = vpop.f32.mrb[0].mxu1  ;;  %v292_v37 = vpop.f32.mrb[1].mxu0 }
 0x106   : > { %v400_v38 = vmul.f32 %v393_v36, %v393_v36  ;;  %v399_v39 = vmul.f32 %v292_v37, %v292_v37  ;;  %v395_v40 = vpop.f32.mrb[1].mxu1 }
 0x107   : > { %v401_v41 = vmul.f32 %v395_v40, %v395_v40 }
 0x108   : > { %v402_v42 = vadd.f32 %v400_v38, %v398_v35 }
 0x109   : > { %v403_v43 = vadd.f32 %v401_v41, %v399_v39 }
 0x10a   : > { %404 = vst [vmem:[%s183_s26] sm:$0xff] %v402_v42 }
 0x10b   : > { %406 = vst.msk [vmem:[%s183_s26 + $0x8] sm:$0xff] %vm405_vm0, %v403_v43 }
 0x10c   : > { %643 = shalt.err (!%p640_p5)
}
 0x10d   : > { %s644_s8 = scalar_lea.hbm %s991_s30, 256  ;;  %s648_s11 = scalar_lea.hbm %s1041_s3, 2048 }
 0x10e   : > { %p645_p6 = scmp.ne.s32.totalorder %s991_s30, %s644_s8  ;;  %p649_p10 = scmp.lt.u32.totalorder %s991_s30, %s1041_s3 }
 0x10f   : > { %p650_p11 = scmp.lt.u32.totalorder %s648_s11, %s644_s8  ;;  %p652_p13 = scmp.lt.u32.totalorder %s644_s8, %s991_s30 }
 0x110   : > { %p646_p7 = pnand %p645_p6, %p772_p4 }
 0x111   : > { %p651_p12 = por %p650_p11, %p649_p10 }
 0x112   : > { %p647_p9 = pneg %p646_p7 }
 0x113   : > { %p653_p0 = por %p652_p13, %p651_p12 }
 0x115   : > { %p654_p1 = pnand %p653_p0, %p647_p9 }
 0x117   : > { %657 = shalt.err (!%p654_p1)
}
 0x118   : > { %574 = dma.vmem_to_hbm [thread:$0]  (%p772_p4), %s993_s27, 256, %s991_s30, %s408_s4  }
 0x119 PF: > { %p580_p2 = scmp.ge.s32.totalorder %s708_s17, 2  ;;  %s436_s23 = sand.u32 1, %s688_s12  }
 0x11a   : > { %s437_s19 = scalar_lea.sflag [#allocation3], %s436_s23 }
 0x11b   : > { %p577_p3 = pnand %p580_p2, %p779_p8 }
 0x11d   : > { %683 = dma.done.wait (!%p577_p3), %s437_s19, 256  }
 0x11e   : > { %685 = vsyncadd (!%p577_p3), %s437_s19, 4294967040  ;;  %s16_s17 = sadd.s32 1, %s708_s17   ;;  %s1044_s12 = smov %s692_s13 }
 0x11f   : > { %p13_p5 = scmp.ge.s32.totalorder %s16_s17, 10   ;;  %s1045_s13 = smov %s696_s14 }
 0x120   : > { %s1046_s14 = smov %s785_s25  ;;  %s1047_s15 = smov %s704_s16 }
 0x121   : > { %s1048_s16 = smov %s1050_s20  ;;  %15 = sbr.rel (!%p13_p5) target bundleno = 4 (0x4), region = 67 }
 0x128   :  { %442 = vsyncpa [#allocation3], 1 }
 0x129   :  { %444 = vsyncpa [#allocation3 + $0x1], 1 }

</bundles_post_ra>
